<compile_context>
chip_gen: v7x
topology: tpu7x:2x2x1
jax: 0.10.0
libtpu: 0.0.40
codegen_flags: <defaults>
</compile_context>

<pallas_src>
import functools

import jax
import jax.numpy as jnp
from jax.experimental import pallas as pl
from jax.experimental.pallas import tpu as pltpu


# ---------------------------------------------------------------------------
# Kernel
# ---------------------------------------------------------------------------
def _outconv_kernel(x_ref, w_ref, b_ref, o_ref, *, bn, use_mxu, precision):
    """One (batch-block, spatial-tile) grid step.

    x_ref: (Bn, C_in, thw)   channels on sublanes, pixels on lanes
    w_ref: (C_out, C_in)     weight
    b_ref: (C_out, 1)        bias (f32)
    o_ref: (Bn, C_out, thw)  lane-dense output tile
    """
    w = w_ref[...]
    bcol = b_ref[...].astype(jnp.float32)                  # (C_out, 1)
    if not use_mxu:
        wf = w.astype(jnp.float32)

    for b in range(bn):                                     # static unroll
        x = x_ref[b]                                        # (C_in, thw)
        if use_mxu:
            # MXU path, f32 accumulation. precision=HIGHEST for f32 inputs
            # (free: kernel is HBM-bound, MXU has large slack).
            acc = jnp.dot(w, x, preferred_element_type=jnp.float32,
                          precision=precision)
        else:
            # Tiny contraction (C_in<=8, C_out<=64): unrolled VPU broadcast
            # FMAs with two interleaved accumulators (shorter serial chain).
            xf = x.astype(jnp.float32)
            c_in = xf.shape[0]
            acc_a = wf[:, 0:1] * xf[0:1, :]
            acc_b = wf[:, 1:2] * xf[1:2, :] if c_in > 1 else None
            ci = 2
            while ci < c_in:
                acc_a = acc_a + wf[:, ci:ci + 1] * xf[ci:ci + 1, :]
                ci += 1
                if ci < c_in:
                    acc_b = acc_b + wf[:, ci:ci + 1] * xf[ci:ci + 1, :]
                    ci += 1
            acc = acc_a if acc_b is None else acc_a + acc_b
        o_ref[b] = (acc + bcol).astype(o_ref.dtype)


# ---------------------------------------------------------------------------
# Generation-aware VMEM budget
# ---------------------------------------------------------------------------
def _vmem_budget():
    """Return (scoped vmem_limit cap, per-block byte budget) for this TPU."""
    phys = 0
    try:
        phys = int(getattr(pltpu.get_tpu_info(), "vmem_capacity_bytes", 0))
    except Exception:
        phys = 0
    if phys <= 0:
        kind = ""
        try:
            kind = jax.devices()[0].device_kind.lower()
        except Exception:
            pass
        if "v7" in kind:
            phys = 64 << 20
        elif ("v2" in kind) or ("v3" in kind):
            phys = 32 << 20
        else:
            phys = 128 << 20                      # v4 / v5e / v5p / v6e
    if phys >= (128 << 20):
        return 96 << 20, 24 << 20                 # v5e / v6e: uncap tiles
    if phys >= (64 << 20):
        return 40 << 20, 8 << 20                  # v7x: tighter 64 MiB budget
    return 16 << 20, 4 << 20                      # small / unknown parts


# ---------------------------------------------------------------------------
# Wrapper
# ---------------------------------------------------------------------------
@functools.partial(jax.jit, static_argnames=("thw", "compute_dtype"))
def out_conv(x_nchw, weight, bias, *, thw=None, compute_dtype=None):
    """1x1 Conv2d forward, matching torch.nn.Conv2d(in, out, kernel_size=1).

    x_nchw : (N, C_in, H, W)
    weight : (C_out, C_in) or (C_out, C_in, 1, 1)  (PyTorch layout)
    bias   : (C_out,)
    thw    : spatial tile in pixels (None = auto, as large as the per-gen
             VMEM block budget allows, up to 32768)
    compute_dtype : None ("auto", follow x's dtype) or e.g. jnp.bfloat16 to
             force-cast x/w reads (f32 accumulation either way; output keeps
             x's dtype).
    returns: (N, C_out, H, W)
    """
    N, C_in, H, W = x_nchw.shape
    HW = H * W
    w2 = weight.reshape(weight.shape[0], -1)                # (C_out, C_in)
    C_out = w2.shape[0]
    out_dtype = x_nchw.dtype
    b_col = bias.reshape(C_out, 1).astype(jnp.float32)

    # NCHW -> (N, C_in, H*W): pure reshape, no data movement.
    x3 = x_nchw.reshape(N, C_in, HW)

    # ---- dtype policy ----------------------------------------------------
    if compute_dtype is not None:
        x3 = x3.astype(compute_dtype)
        w2 = w2.astype(compute_dtype)
    else:
        # "auto": keep x's dtype (no extra wrapper-side HBM pass over x);
        # weight is tiny, match it to x so the MXU sees a uniform dtype.
        w2 = w2.astype(x3.dtype)
    x_isz = jnp.dtype(x3.dtype).itemsize
    o_isz = jnp.dtype(out_dtype).itemsize
    w_isz = jnp.dtype(w2.dtype).itemsize

    vmem_cap, max_block_bytes = _vmem_budget()

    # ---- spatial tile selection -------------------------------------------
    # x+y single-buffer bytes per pixel; y counted at OUTPUT itemsize.
    bytes_per_px = x_isz * C_in + o_isz * C_out
    cap_px = max(128, ((max_block_bytes // bytes_per_px) // 128) * 128)
    req_px = 32768 if thw is None else max(128, (thw // 128) * 128)
    tile_px = min(cap_px, req_px)
    if N == 1 and HW > 128:
        # Guarantee >= 2 spatial tiles so both v7x TensorCores get work.
        half = -(-HW // 2)
        tile_px = min(tile_px, max(128, (-(-half // 128)) * 128))
    if HW <= tile_px:
        thw_eff = HW                       # single tile: full-dim block
    else:
        thw_eff = (tile_px // 128) * 128   # lane-dense 128-multiple, <= HW
    n_sp = pl.cdiv(HW, thw_eff)            # ragged edge handled by Pallas

    # ---- batch blocking for small images ----------------------------------
    Bn = 1
    if n_sp == 1 and N > 1:
        want = max(1, min(N, 2048 // max(thw_eff, 1)))
        for d in range(want, 0, -1):       # largest divisor of N that fits
            if N % d == 0 and d * thw_eff * bytes_per_px <= max_block_bytes:
                Bn = d
                break
        if N // Bn < 2:                    # keep >= 2 grid steps (megacore)
            for d in range(Bn, 0, -1):
                if N % d == 0 and N // d >= 2:
                    Bn = d
                    break
    n_b = N // Bn

    # ---- BlockSpecs --------------------------------------------------------
    x_map = lambda n, j: (n, 0, j)
    o_map = lambda n, j: (n, 0, j)
    wb_map = lambda n, j: (0, 0)

    x_block_bytes = x_isz * Bn * C_in * thw_eff
    total_steps = n_b * n_sp
    if x_block_bytes <= (256 << 10) and total_steps >= 3:
        # Small per-step x DMA: 3-deep pipeline hides DMA latency cheaply.
        x_spec = pl.BlockSpec((Bn, C_in, thw_eff), x_map,
                              pipeline_mode=pl.Buffered(3))
        n_xbuf = 3
    else:
        x_spec = pl.BlockSpec((Bn, C_in, thw_eff), x_map)
        n_xbuf = 2

    if C_in * C_out * w_isz >= (256 << 10):
        # Grid-invariant and big enough to matter: single-buffer.
        w_spec = pl.BlockSpec((C_out, C_in), wb_map, pipeline_mode=pl.Buffered(1))
        b_spec = pl.BlockSpec((C_out, 1), wb_map, pipeline_mode=pl.Buffered(1))
        n_wbuf = 1
    else:
        w_spec = pl.BlockSpec((C_out, C_in), wb_map)
        b_spec = pl.BlockSpec((C_out, 1), wb_map)
        n_wbuf = 2

    # VMEM accounting with correct per-stream itemsizes.
    vmem_need = (n_xbuf * x_block_bytes
                 + 2 * o_isz * Bn * C_out * thw_eff
                 + n_wbuf * w_isz * C_in * C_out
                 + 2 * 4 * C_out)
    vmem_limit = int(min(max(2 * vmem_need, 16 << 20), vmem_cap))

    use_mxu = not (C_in <= 8 and C_out <= 64)
    precision = (jax.lax.Precision.HIGHEST
                 if jnp.dtype(x3.dtype) == jnp.float32
                 else jax.lax.Precision.DEFAULT)

    kernel = functools.partial(_outconv_kernel, bn=Bn, use_mxu=use_mxu,
                               precision=precision)

    cost = pl.CostEstimate(
        flops=2 * N * HW * C_in * C_out,
        transcendentals=0,
        bytes_accessed=(N * HW * C_in * x_isz + N * HW * C_out * o_isz
                        + C_in * C_out * w_isz + C_out * 4),
    )

    y3 = pl.pallas_call(
        kernel,
        out_shape=jax.ShapeDtypeStruct((N, C_out, HW), out_dtype),
        grid_spec=pltpu.PrefetchScalarGridSpec(
            num_scalar_prefetch=0,
            grid=(n_b, n_sp),
            in_specs=[x_spec, w_spec, b_spec],
            out_specs=pl.BlockSpec((Bn, C_out, thw_eff), o_map),
        ),
        compiler_params=pltpu.CompilerParams(
            dimension_semantics=("parallel", "parallel"),
            vmem_limit_bytes=vmem_limit,
        ),
        cost_estimate=cost,
    )(x3, w2, b_col)

    # (N, C_out, H*W) -> NCHW: pure reshape, no slice / transpose.
    return y3.reshape(N, C_out, H, W)


# ---------------------------------------------------------------------------
# Self-test
# ---------------------------------------------------------------------------
if __name__ == "__main__":
    key = jax.random.PRNGKey(0)
    kx, kw, kb, kx2, kw2, kb2, kx3, kw3, kb3 = jax.random.split(key, 9)

    # --- Test 1: small OutConv (VPU path), f32, exact ----------------------
    N, C_in, H, W = 2, 4, 16, 16
    C_out = 3
    x = jax.random.normal(kx, (N, C_in, H, W), dtype=jnp.float32)
    bound = 1.0 / (C_in ** 0.5)   # nn.Conv2d default init range
    weight = jax.random.uniform(kw, (C_out, C_in), jnp.float32, -bound, bound)
    bias = jax.random.uniform(kb, (C_out,), jnp.float32, -bound, bound)

    y = jax.block_until_ready(out_conv(x, weight, bias))
    y_ref = jnp.einsum("nchw,oc->nohw", x, weight,
                       precision=jax.lax.Precision.HIGHEST) \
        + bias[None, :, None, None]
    assert y.shape == (N, C_out, H, W)
    assert jnp.allclose(y, y_ref, atol=1e-5, rtol=1e-5), \
        float(jnp.max(jnp.abs(y - y_ref)))

    # --- Test 2: ragged spatial + larger channels (MXU path, f32 HIGHEST) --
    N2, C_in2, H2, W2, C_out2 = 2, 32, 10, 10, 16
    x2 = jax.random.normal(kx2, (N2, C_in2, H2, W2), dtype=jnp.float32)
    bound2 = 1.0 / (C_in2 ** 0.5)
    weight2 = jax.random.uniform(kw2, (C_out2, C_in2, 1, 1), jnp.float32,
                                 -bound2, bound2)   # PyTorch 4-D weight layout
    bias2 = jax.random.uniform(kb2, (C_out2,), jnp.float32, -bound2, bound2)

    y2 = jax.block_until_ready(out_conv(x2, weight2, bias2))
    y2_ref = jnp.einsum("nchw,oc->nohw", x2, weight2[:, :, 0, 0],
                        precision=jax.lax.Precision.HIGHEST) \
        + bias2[None, :, None, None]
    assert y2.shape == (N2, C_out2, H2, W2)
    # precision=HIGHEST in-kernel -> tight tolerance (no bf16-pass rounding).
    assert jnp.allclose(y2, y2_ref, atol=1e-3, rtol=1e-3), \
        float(jnp.max(jnp.abs(y2 - y2_ref)))

    # --- Test 3: bf16 activations (halved HBM read stream, f32 accumulation)
    N3, C_in3, H3, W3, C_out3 = 2, 64, 16, 16, 2
    x3 = jax.random.normal(kx3, (N3, C_in3, H3, W3),
                           dtype=jnp.float32).astype(jnp.bfloat16)
    bound3 = 1.0 / (C_in3 ** 0.5)
    weight3 = jax.random.uniform(kw3, (C_out3, C_in3), jnp.float32,
                                 -bound3, bound3)
    bias3 = jax.random.uniform(kb3, (C_out3,), jnp.float32, -bound3, bound3)

    y3 = jax.block_until_ready(out_conv(x3, weight3, bias3))
    w3_bf = weight3.astype(jnp.bfloat16).astype(jnp.float32)
    y3_ref = jnp.einsum("nchw,oc->nohw", x3.astype(jnp.float32), w3_bf,
                        precision=jax.lax.Precision.HIGHEST) \
        + bias3[None, :, None, None]
    assert y3.shape == (N3, C_out3, H3, W3)
    assert y3.dtype == jnp.bfloat16
    assert jnp.allclose(y3.astype(jnp.float32), y3_ref, atol=2e-2, rtol=2e-2), \
        float(jnp.max(jnp.abs(y3.astype(jnp.float32) - y3_ref)))

    print("KERNEL_OK")
</pallas_src>

<mosaic_0001>
module attributes {stable_mosaic.version = 11 : i64} {
  func.func @_outconv_kernel(%arg0: i32, %arg1: i32, %arg2: memref<1x4x256xf32, #tpu.memory_space<vmem>>, %arg3: memref<3x4xf32, #tpu.memory_space<vmem>>, %arg4: memref<3x1xf32, #tpu.memory_space<vmem>>, %arg5: memref<1x3x256xf32, #tpu.memory_space<vmem>>) attributes {dimension_semantics = [#tpu.dimension_semantics<parallel>, #tpu.dimension_semantics<parallel>], iteration_bounds = array<i64: 2, 1>, scalar_prefetch = 0 : i64, scratch_operands = 0 : i64, tpu.core_type = #tpu.core_type<tc>, window_params = [{transform_indices = @transform_0, window_bounds = array<i64: 1, 4, 256>}, {pipeline_mode = #tpu.pipeline_mode<synchronous>, transform_indices = @transform_1, window_bounds = array<i64: 3, 4>}, {pipeline_mode = #tpu.pipeline_mode<synchronous>, transform_indices = @transform_2, window_bounds = array<i64: 3, 1>}, {transform_indices = @transform_3, window_bounds = array<i64: 1, 3, 256>}]} {
    %c0 = arith.constant 0 : index
    %c0_0 = arith.constant 0 : index
    %0 = vector.load %arg3[%c0, %c0_0] : memref<3x4xf32, #tpu.memory_space<vmem>>, vector<3x4xf32>
    %c0_1 = arith.constant 0 : index
    %c0_2 = arith.constant 0 : index
    %1 = vector.load %arg4[%c0_1, %c0_2] : memref<3x1xf32, #tpu.memory_space<vmem>>, vector<3x1xf32>
    %c0_3 = arith.constant 0 : index
    %c0_4 = arith.constant 0 : index
    %c0_5 = arith.constant 0 : index
    %2 = vector.load %arg2[%c0_3, %c0_4, %c0_5] : memref<1x4x256xf32, #tpu.memory_space<vmem>>, vector<1x4x256xf32>
    %3 = vector.shape_cast %2 : vector<1x4x256xf32> to vector<4x256xf32>
    %4 = vector.extract_strided_slice %0 {offsets = [0, 0], sizes = [3, 1], strides = [1, 1]} : vector<3x4xf32> to vector<3x1xf32>
    %5 = vector.extract_strided_slice %3 {offsets = [0, 0], sizes = [1, 256], strides = [1, 1]} : vector<4x256xf32> to vector<1x256xf32>
    %6 = vector.broadcast %4 : vector<3x1xf32> to vector<3x256xf32>
    %7 = vector.broadcast %5 : vector<1x256xf32> to vector<3x256xf32>
    %8 = arith.mulf %6, %7 : vector<3x256xf32>
    %9 = vector.extract_strided_slice %0 {offsets = [0, 1], sizes = [3, 1], strides = [1, 1]} : vector<3x4xf32> to vector<3x1xf32>
    %10 = vector.extract_strided_slice %3 {offsets = [1, 0], sizes = [1, 256], strides = [1, 1]} : vector<4x256xf32> to vector<1x256xf32>
    %11 = vector.broadcast %9 : vector<3x1xf32> to vector<3x256xf32>
    %12 = vector.broadcast %10 : vector<1x256xf32> to vector<3x256xf32>
    %13 = arith.mulf %11, %12 : vector<3x256xf32>
    %14 = vector.extract_strided_slice %0 {offsets = [0, 2], sizes = [3, 1], strides = [1, 1]} : vector<3x4xf32> to vector<3x1xf32>
    %15 = vector.extract_strided_slice %3 {offsets = [2, 0], sizes = [1, 256], strides = [1, 1]} : vector<4x256xf32> to vector<1x256xf32>
    %16 = vector.broadcast %14 : vector<3x1xf32> to vector<3x256xf32>
    %17 = vector.broadcast %15 : vector<1x256xf32> to vector<3x256xf32>
    %18 = arith.mulf %16, %17 : vector<3x256xf32>
    %19 = arith.addf %8, %18 : vector<3x256xf32>
    %20 = vector.extract_strided_slice %0 {offsets = [0, 3], sizes = [3, 1], strides = [1, 1]} : vector<3x4xf32> to vector<3x1xf32>
    %21 = vector.extract_strided_slice %3 {offsets = [3, 0], sizes = [1, 256], strides = [1, 1]} : vector<4x256xf32> to vector<1x256xf32>
    %22 = vector.broadcast %20 : vector<3x1xf32> to vector<3x256xf32>
    %23 = vector.broadcast %21 : vector<1x256xf32> to vector<3x256xf32>
    %24 = arith.mulf %22, %23 : vector<3x256xf32>
    %25 = arith.addf %13, %24 : vector<3x256xf32>
    %26 = arith.addf %19, %25 : vector<3x256xf32>
    %27 = vector.broadcast %1 : vector<3x1xf32> to vector<3x256xf32>
    %28 = arith.addf %26, %27 : vector<3x256xf32>
    %c0_6 = arith.constant 0 : index
    %c0_7 = arith.constant 0 : index
    %c0_8 = arith.constant 0 : index
    %29 = vector.load %arg5[%c0_6, %c0_7, %c0_8] : memref<1x3x256xf32, #tpu.memory_space<vmem>>, vector<1x3x256xf32>
    %30 = vector.shape_cast %29 : vector<1x3x256xf32> to vector<3x256xf32>
    %31 = vector.shape_cast %28 : vector<3x256xf32> to vector<1x3x256xf32>
    tpu.vector_store %arg5[%c0_6, %c0_7, %c0_8], %31 {strides = array<i32>} : memref<1x3x256xf32, #tpu.memory_space<vmem>>, vector<1x3x256xf32>,
    return
  }
  func.func @transform_0(%arg0: i32, %arg1: i32) -> (i32, i32, i32) {
    %c0_i32 = arith.constant 0 : i32
    %c0_i32_0 = arith.constant 0 : i32
    return %arg0, %c0_i32, %arg1 : i32, i32, i32
  }
  func.func @transform_1(%arg0: i32, %arg1: i32) -> (i32, i32) {
    %c0_i32 = arith.constant 0 : i32
    %c0_i32_0 = arith.constant 0 : i32
    %c0_i32_1 = arith.constant 0 : i32
    return %c0_i32, %c0_i32_0 : i32, i32
  }
  func.func @transform_2(%arg0: i32, %arg1: i32) -> (i32, i32) {
    %c0_i32 = arith.constant 0 : i32
    %c0_i32_0 = arith.constant 0 : i32
    %c0_i32_1 = arith.constant 0 : i32
    return %c0_i32, %c0_i32_0 : i32, i32
  }
  func.func @transform_3(%arg0: i32, %arg1: i32) -> (i32, i32, i32) {
    %c0_i32 = arith.constant 0 : i32
    %c0_i32_0 = arith.constant 0 : i32
    return %arg0, %c0_i32, %arg1 : i32, i32, i32
  }
}

</mosaic_0001>

<bundles_post_ra>
// kernel: out_conv.1
= control target key start
LH: loop header
LB: loop body
LE: loop exit
PB: predicated region body
PF: predicated region fallthrough
CT: control target
= control target key end

     0   :  { %s511_s12 = smov 0   ;;  %s513_s13 = smov 0   ;;  %s557_s0 = inlined_call_operand.vmem [shape: f32[2,4,256], index: 0, kind: input, shape index: {}]   ;;  %s558_s1 = inlined_call_operand.vmem [shape: f32[3,4], index: 1, kind: input, shape index: {}]   ;;  %s559_s2 = inlined_call_operand.vmem [shape: f32[3,1], index: 2, kind: input, shape index: {}]   ;;  %s560_s3 = inlined_call_operand.vmem [shape: f32[2,3,256], index: 3, kind: output, shape index: {}]  }
   0x1   :  { %s515_s14 = smov 0  }
   0x2 LB: > { %s25_s15 = sadd.s32 1, %s481_s13  ;;  %p420_p0 = scmp.ge.s32.totalorder %s485_s14, 1  ;;  %s485_s14 = sphi %s515_s14, %s13_s14   ;;  %s481_s13 = sphi %s513_s13, %s562_s13   ;;  %s477_s12 = sphi %s511_s12, %s561_s12  }
   0x3   : > { %p27_p1 = scmp.ge.s32.totalorder %s25_s15, 2  ;;  %p158_p2 = scmp.lt.s32.totalorder %s485_s14, 3 }
   0x5   : > { %s564_s15 = smov (%p27_p1, %s25_s15), 0  ;;  %p159_p3 = pnand %p420_p0, %p158_p2 }
   0x6   : > { %v210_v0 = vld [vmem:[%s558_s1] sm:$0x7] (!%p159_p3)  ;;  %v487_v1 = vmov (!%p159_p3), 2   ;;  %v488_v2 = vmov (!%p159_p3), 0   ;;  %v489_v3 = vmov (!%p159_p3), 3   ;;  %v490_v4 = vmov (!%p159_p3), 1  }
   0x7   : > { %162 = sbr.rel (%p159_p3) target bundleno = 152 (0x98), region = 32  ;;  %459 = vset.pattern.permute.xlu1 (!%p159_p3), %v487_v1  ;;  %457 = vset.pattern.permute.xlu0 (!%p159_p3), %v488_v2  ;;  %v211_v5 = vld [vmem:[%s559_s2] sm:$0x7] (!%p159_p3)  ;;  %p191_p4 = scmp.lt.s32.totalorder (!%p159_p3), %s477_s12, 1  ;;  %v219_v6 = vlaneseq (!%p159_p3) }
   0x8   : > { %264 = vperm.xlu1 (!%p159_p3), %459, %v210_v0   ;;  %215 = vperm.xlu0 (!%p159_p3), %457, %v210_v0  }
   0x9   : > { %v220_v7 = vshrl.u32 (!%p159_p3), %v219_v6, 7 }
   0xb   : > { %v269_v8 = vsub.s32 (!%p159_p3), 2, %v220_v7  ;;  %v273_v9 = vsub.s32 (!%p159_p3), 6, %v220_v7  ;;  %v221_v10 = vsub.s32 (!%p159_p3), 0, %v220_v7  ;;  %v225_v11 = vsub.s32 (!%p159_p3), 4, %v220_v7 }
   0xc   : > { %460 = vset.pattern.permute.xlu1 (!%p159_p3), %v489_v3  ;;  %458 = vset.pattern.permute.xlu0 (!%p159_p3), %v490_v4  ;;  %v295_v13 = vsub.s32 (!%p159_p3), 3, %v220_v7  ;;  %v299_v14 = vsub.s32 (!%p159_p3), 7, %v220_v7  ;;  %v245_v15 = vsub.s32 (!%p159_p3), 1, %v220_v7  ;;  %v249_v16 = vsub.s32 (!%p159_p3), 5, %v220_v7 }
   0xd   : > { %290 = vperm.xlu1 (!%p159_p3), %460, %v210_v0   ;;  %240 = vperm.xlu0 (!%p159_p3), %458, %v210_v0  }
   0xe   : > { %s566_s12 = smov (!%p191_p4, %s477_s12), 1 }
   0xf   : > { %s427_s20 = sshll.u32 %s566_s12, 3 }
  0x10   : > { %s198_s23 = scalar_lea.vmem %s557_s0, %s427_s20  ;;  %s208_s26 = scalar_lea.vmem %s560_s3, %s427_s20 }
  0x11   : > { %461 = vset.pattern.permute.xlu1 %v488_v2  ;;  %462 = vset.pattern.permute.xlu0 %v488_v2  ;;  %v212_v12 = vld [vmem:[%s198_s23] sm:$0xff] }
  0x12   : > { %319 = vperm.xlu1 %461, %v211_v5   ;;  %v270_v17 = vrot.slane %v212_v12, %v269_v8  ;;  %v274_v18 = vrot.slane %v212_v12, %v273_v9  ;;  %v222_v19 = vrot.slane %v212_v12, %v221_v10  ;;  %v226_v20 = vrot.slane %v212_v12, %v225_v11 }
  0x13   : > { %v296_v21 = vrot.slane %v212_v12, %v295_v13  ;;  %v300_v22 = vrot.slane %v212_v12, %v299_v14  ;;  %v246_v23 = vrot.slane %v212_v12, %v245_v15  ;;  %v250_v24 = vrot.slane %v212_v12, %v249_v16 }
  0x14   : > { %v280_v26 = vrot.slane %v270_v17, %v269_v8  ;;  %v284_v27 = vrot.slane %v274_v18, %v269_v8  ;;  %v232_v29 = vrot.slane %v222_v19, %v221_v10  ;;  %v236_v30 = vrot.slane %v226_v20, %v221_v10 }
  0x15   : > { %v306_v31 = vrot.slane %v296_v21, %v295_v13  ;;  %v310_v32 = vrot.slane %v300_v22, %v295_v13  ;;  %v256_v33 = vrot.slane %v246_v23, %v245_v15  ;;  %v260_v34 = vrot.slane %v250_v24, %v245_v15 }
  0x87   : > { %v265_v25 = vpop.permute.xlu1 %264  ;;  %v216_v28 = vpop.permute.xlu0 %215 }
  0x88   : > { %v285_v35 = vmul.f32 %v280_v26, %v265_v25  ;;  %v286_v36 = vmul.f32 %v284_v27, %v265_v25  ;;  %v237_v37 = vmul.f32 %v232_v29, %v216_v28  ;;  %v238_v38 = vmul.f32 %v236_v30, %v216_v28 }
  0x8a   : > { %v287_v45 = vadd.f32 %v285_v35, %v237_v37  ;;  %v288_v46 = vadd.f32 %v286_v36, %v238_v38 }
  0x8c   : > { %v291_v39 = vpop.permute.xlu1 %290  ;;  %v241_v40 = vpop.permute.xlu0 %240 }
  0x8d   : > { %v311_v41 = vmul.f32 %v306_v31, %v291_v39  ;;  %v312_v42 = vmul.f32 %v310_v32, %v291_v39  ;;  %v261_v43 = vmul.f32 %v256_v33, %v241_v40  ;;  %v262_v44 = vmul.f32 %v260_v34, %v241_v40 }
  0x8f   : > { %v313_v47 = vadd.f32 %v311_v41, %v261_v43  ;;  %v314_v48 = vadd.f32 %v312_v42, %v262_v44 }
  0x91   : > { %v320_v49 = vpop.permute.xlu1 %319  ;;  %v315_v50 = vadd.f32 %v313_v47, %v287_v45  ;;  %v316_v51 = vadd.f32 %v314_v48, %v288_v46 }
  0x93   : > { %v322_v52 = vadd.f32 %v320_v49, %v315_v50  ;;  %v323_v53 = vadd.f32 %v320_v49, %v316_v51 }
  0x95   : > { %v326_v54 = vcombine.low %v322_v52, %v323_v53 }
  0x97   : > { %328 = vst [vmem:[%s208_s26] sm:$0x77] %v326_v54 }
  0x98 PF: > { %s13_s14 = sadd.s32 1, %s485_s14   ;;  %s561_s12 = smov %s481_s13 }
  0x99   : > { %p10_p5 = scmp.ge.s32.totalorder %s13_s14, 4   ;;  %s562_s13 = smov %s564_s15 }
  0x9b   :  { %12 = sbr.rel (!%p10_p5) target bundleno = 2 (0x2), region = 62 }

</bundles_post_ra>
